<compile_context>
chip_gen: v7x
topology: tpu7x:2x2x1
jax: 0.10.0
libtpu: 0.0.40
codegen_flags: <defaults>
</compile_context>

<pallas_src>
import functools

import jax
import jax.numpy as jnp
from jax import lax
from jax.experimental import pallas as pl
from jax.experimental.pallas import tpu as pltpu


# ---------------------- fused forward kernel (per batch) ---------------------


def fused_self_attention_kernel(
    x_ref, wqkv_ref, bqkv_ref, wfc_ref, bfc_ref, o_ref, attn_scratch,
    *, heads, dh, scale, compute_dtype,
):
    # x_ref      : (1, S, E)      current batch element
    # wqkv_ref   : (E, 3E)        resident across the whole grid
    # bqkv_ref   : (1, 3E)
    # wfc_ref    : (E, E)
    # bfc_ref    : (1, E)
    # o_ref      : (1, S, E)
    # attn_scratch: (S, E) f32    per-head outputs merged lane-dense
    x = x_ref[0].astype(compute_dtype)  # (S, E)

    # qkv projection on the MXU; bias broadcast over rows. Columns keep the
    # PyTorch .view(B, S, H, 3, Dh) layout: index = h*3*dh + {q,k,v}*dh + d.
    qkv = (
        jnp.dot(x, wqkv_ref[...].astype(compute_dtype),
                preferred_element_type=jnp.float32)
        + bqkv_ref[...]
    )  # (S, 3E) f32

    for h in range(heads):  # static unroll; h is a Python int
        base = h * 3 * dh
        # fold the softmax scale into q: (S, Dh) VPU mul instead of (S, S)
        q = (qkv[:, base:base + dh] * scale).astype(compute_dtype)
        k = qkv[:, base + dh:base + 2 * dh].astype(compute_dtype)
        v = qkv[:, base + 2 * dh:base + 3 * dh].astype(compute_dtype)

        # contract last dims directly -> no k.T relayout, MXU-fed dot_general
        s = lax.dot_general(
            q, k, (((1,), (1,)), ((), ())), preferred_element_type=jnp.float32
        )  # (S, S) f32

        m = jnp.max(s, axis=-1, keepdims=True)
        p = jnp.exp(s - m)
        p = p * pl.reciprocal(jnp.sum(p, axis=-1, keepdims=True), approx=True)

        attn_scratch[:, h * dh:(h + 1) * dh] = jnp.dot(
            p.astype(compute_dtype), v, preferred_element_type=jnp.float32
        )  # (S, Dh)

    # output projection, single dense (S, E) store
    out = (
        jnp.dot(attn_scratch[...].astype(compute_dtype),
                wfc_ref[...].astype(compute_dtype),
                preferred_element_type=jnp.float32)
        + bfc_ref[...]
    )  # (S, E) f32
    o_ref[0] = out.astype(o_ref.dtype)


# --------------------------- module forward pass ----------------------------


def self_attention_forward(x, params, heads, *, compute_dtype=jnp.float32):
    """Pallas re-implementation of SelfAttention.forward.

    x: (B, S, E) float32
    params: 'qkv_w' (E, 3E), 'qkv_b' (3E,), 'fc_w' (E, E), 'fc_b' (E,)
    Use compute_dtype=jnp.bfloat16 on v6e/v7x for ~2x MXU/HBM efficiency.
    """
    B, S, E = x.shape
    dh = E // heads
    scale = dh ** (-0.5)

    wqkv = params["qkv_w"].astype(jnp.float32)               # (E, 3E)
    bqkv = params["qkv_b"].reshape(1, 3 * E).astype(jnp.float32)
    wfc = params["fc_w"].astype(jnp.float32)                 # (E, E)
    bfc = params["fc_b"].reshape(1, E).astype(jnp.float32)

    cost = pl.CostEstimate(
        flops=(2 * B * S * E * 3 * E
               + 4 * B * heads * S * S * dh
               + 2 * B * S * E * E),
        transcendentals=B * heads * S * S,
        bytes_accessed=4 * (2 * B * S * E + E * 3 * E + 3 * E + E * E + E),
    )

    kernel = functools.partial(
        fused_self_attention_kernel,
        heads=heads, dh=dh, scale=scale, compute_dtype=compute_dtype,
    )
    return pl.pallas_call(
        kernel,
        out_shape=jax.ShapeDtypeStruct((B, S, E), jnp.float32),
        grid_spec=pltpu.PrefetchScalarGridSpec(
            num_scalar_prefetch=0,
            grid=(B,),
            in_specs=[
                pl.BlockSpec((1, S, E), lambda b: (b, 0, 0)),      # x
                pl.BlockSpec((E, 3 * E), lambda b: (0, 0)),        # qkv weight
                pl.BlockSpec((1, 3 * E), lambda b: (0, 0)),        # qkv bias
                pl.BlockSpec((E, E), lambda b: (0, 0)),            # fc weight
                pl.BlockSpec((1, E), lambda b: (0, 0)),            # fc bias
            ],
            out_specs=pl.BlockSpec((1, S, E), lambda b: (b, 0, 0)),
            scratch_shapes=[pltpu.VMEM((S, E), jnp.float32)],
        ),
        compiler_params=pltpu.CompilerParams(
            dimension_semantics=("parallel",),   # batch split across TCs
            vmem_limit_bytes=48 * 1024 * 1024,   # headroom under v7x's 64 MiB
        ),
        cost_estimate=cost,
    )(x.astype(jnp.float32), wqkv, bqkv, wfc, bfc)


# ------------------------------ pure-JAX ref ---------------------------------


def self_attention_ref(x, params, heads):
    B, S, E = x.shape
    dh = E // heads
    scale = dh ** (-0.5)
    qkv = (x.reshape(B * S, E) @ params["qkv_w"] + params["qkv_b"]).reshape(
        B, S, heads, 3, dh
    )
    q = jnp.transpose(qkv[..., 0, :], (0, 2, 1, 3))
    k = jnp.transpose(qkv[..., 1, :], (0, 2, 1, 3))
    v = jnp.transpose(qkv[..., 2, :], (0, 2, 1, 3))
    s = jnp.einsum("bhqd,bhkd->bhqk", q, k) * scale
    p = jax.nn.softmax(s, axis=-1)
    o = jnp.einsum("bhqk,bhkd->bhqd", p, v)
    o = jnp.transpose(o, (0, 2, 1, 3)).reshape(B, S, E)
    return (o.reshape(B * S, E) @ params["fc_w"] + params["fc_b"]).reshape(B, S, E)


# ---------------------------------- main -------------------------------------


def init_params(key, input_dim):
    # Mimic nn.Linear init: U(-1/sqrt(fan_in), 1/sqrt(fan_in)); weights stored
    # as (in, out) so forward is x @ W + b.
    k1, k2, k3, k4 = jax.random.split(key, 4)
    bound = 1.0 / (input_dim ** 0.5)
    return {
        "qkv_w": jax.random.uniform(
            k1, (input_dim, 3 * input_dim), jnp.float32, -bound, bound
        ),
        "qkv_b": jax.random.uniform(
            k2, (3 * input_dim,), jnp.float32, -bound, bound
        ),
        "fc_w": jax.random.uniform(
            k3, (input_dim, input_dim), jnp.float32, -bound, bound
        ),
        "fc_b": jax.random.uniform(k4, (input_dim,), jnp.float32, -bound, bound),
    }


if __name__ == "__main__":
    B, S, E, HEADS = 2, 8, 32, 4

    key = jax.random.PRNGKey(0)
    kx, kp = jax.random.split(key)
    x = jax.random.normal(kx, (B, S, E), dtype=jnp.float32)
    params = init_params(kp, E)

    fwd = jax.jit(functools.partial(self_attention_forward, heads=HEADS))
    out = jax.block_until_ready(fwd(x, params))

    ref = self_attention_ref(x, params, HEADS)
    assert out.shape == (B, S, E)
    # approx=True reciprocal (EUP vrcp) slightly loosens the tolerance
    assert jnp.allclose(out, ref, atol=5e-3, rtol=5e-3), "mismatch vs reference"

    print("KERNEL_OK")
</pallas_src>

<mosaic_0001>
module attributes {stable_mosaic.version = 11 : i64} {
  func.func @fused_self_attention_kernel(%arg0: i32, %arg1: memref<1x8x32xf32, #tpu.memory_space<vmem>>, %arg2: memref<32x96xf32, #tpu.memory_space<vmem>>, %arg3: memref<1x96xf32, #tpu.memory_space<vmem>>, %arg4: memref<32x32xf32, #tpu.memory_space<vmem>>, %arg5: memref<1x32xf32, #tpu.memory_space<vmem>>, %arg6: memref<1x8x32xf32, #tpu.memory_space<vmem>>, %arg7: memref<8x32xf32, #tpu.memory_space<vmem>>) attributes {dimension_semantics = [#tpu.dimension_semantics<parallel>], iteration_bounds = array<i64: 2>, scalar_prefetch = 0 : i64, scratch_operands = 1 : i64, tpu.core_type = #tpu.core_type<tc>, window_params = [{transform_indices = @transform_0, window_bounds = array<i64: 1, 8, 32>}, {pipeline_mode = #tpu.pipeline_mode<synchronous>, transform_indices = @transform_1, window_bounds = array<i64: 32, 96>}, {pipeline_mode = #tpu.pipeline_mode<synchronous>, transform_indices = @transform_2, window_bounds = array<i64: 1, 96>}, {pipeline_mode = #tpu.pipeline_mode<synchronous>, transform_indices = @transform_3, window_bounds = array<i64: 32, 32>}, {pipeline_mode = #tpu.pipeline_mode<synchronous>, transform_indices = @transform_4, window_bounds = array<i64: 1, 32>}, {transform_indices = @transform_5, window_bounds = array<i64: 1, 8, 32>}]} {
    %c0 = arith.constant 0 : index
    %c0_0 = arith.constant 0 : index
    %c0_1 = arith.constant 0 : index
    %0 = vector.load %arg1[%c0, %c0_0, %c0_1] : memref<1x8x32xf32, #tpu.memory_space<vmem>>, vector<1x8x32xf32>
    %1 = vector.shape_cast %0 : vector<1x8x32xf32> to vector<8x32xf32>
    %c0_2 = arith.constant 0 : index
    %c0_3 = arith.constant 0 : index
    %2 = vector.load %arg2[%c0_2, %c0_3] : memref<32x96xf32, #tpu.memory_space<vmem>>, vector<32x96xf32>
    %cst = arith.constant dense<0.000000e+00> : vector<8x96xf32>
    %3 = tpu.matmul %1, %2, %cst {dimension_numbers = #tpu.dot_dimension_numbers<[1], [0], [0], [1], [0, 0, 1, 1], [], []>} : vector<8x32xf32>, vector<32x96xf32>, vector<8x96xf32> -> vector<8x96xf32>
    %c0_4 = arith.constant 0 : index
    %c0_5 = arith.constant 0 : index
    %4 = vector.load %arg3[%c0_4, %c0_5] : memref<1x96xf32, #tpu.memory_space<vmem>>, vector<1x96xf32>
    %5 = vector.broadcast %4 : vector<1x96xf32> to vector<8x96xf32>
    %6 = arith.addf %3, %5 : vector<8x96xf32>
    %7 = vector.extract_strided_slice %6 {offsets = [0, 0], sizes = [8, 8], strides = [1, 1]} : vector<8x96xf32> to vector<8x8xf32>
    %cst_6 = arith.constant 0.353553385 : f32
    %8 = vector.broadcast %cst_6 : f32 to vector<8x8xf32>
    %9 = arith.mulf %7, %8 : vector<8x8xf32>
    %10 = vector.extract_strided_slice %6 {offsets = [0, 8], sizes = [8, 8], strides = [1, 1]} : vector<8x96xf32> to vector<8x8xf32>
    %11 = vector.extract_strided_slice %6 {offsets = [0, 16], sizes = [8, 8], strides = [1, 1]} : vector<8x96xf32> to vector<8x8xf32>
    %cst_7 = arith.constant dense<0.000000e+00> : vector<8x8xf32>
    %12 = tpu.matmul %9, %10, %cst_7 {dimension_numbers = #tpu.dot_dimension_numbers<[1], [1], [0], [0], [0, 0, 1, 0], [], []>} : vector<8x8xf32>, vector<8x8xf32>, vector<8x8xf32> -> vector<8x8xf32>
    %cst_8 = arith.constant dense<0xFF800000> : vector<8xf32>
    %13 = vector.multi_reduction <maximumf>, %12, %cst_8 [1] : vector<8x8xf32> to vector<8xf32>
    %14 = vector.shape_cast %13 : vector<8xf32> to vector<8x1xf32>
    %15 = vector.broadcast %14 : vector<8x1xf32> to vector<8x8xf32>
    %16 = arith.subf %12, %15 : vector<8x8xf32>
    %17 = math.exp %16 : vector<8x8xf32>
    %cst_9 = arith.constant dense<0.000000e+00> : vector<8xf32>
    %18 = vector.multi_reduction <add>, %17, %cst_9 [1] : vector<8x8xf32> to vector<8xf32>
    %19 = vector.shape_cast %18 : vector<8xf32> to vector<8x1xf32>
    %20 = tpu.reciprocal %19 {approx = true} : vector<8x1xf32> -> vector<8x1xf32>
    %21 = vector.broadcast %20 : vector<8x1xf32> to vector<8x8xf32>
    %22 = arith.mulf %17, %21 : vector<8x8xf32>
    %cst_10 = arith.constant dense<0.000000e+00> : vector<8x8xf32>
    %23 = tpu.matmul %22, %11, %cst_10 {dimension_numbers = #tpu.dot_dimension_numbers<[1], [0], [0], [1], [0, 0, 1, 1], [], []>} : vector<8x8xf32>, vector<8x8xf32>, vector<8x8xf32> -> vector<8x8xf32>
    %c0_11 = arith.constant 0 : index
    %c0_12 = arith.constant 0 : index
    %24 = vector.load %arg7[%c0_11, %c0_12] : memref<8x32xf32, #tpu.memory_space<vmem>>, vector<8x8xf32>
    tpu.vector_store %arg7[%c0_11, %c0_12], %23 {strides = array<i32>} : memref<8x32xf32, #tpu.memory_space<vmem>>, vector<8x8xf32>,
    %25 = vector.extract_strided_slice %6 {offsets = [0, 24], sizes = [8, 8], strides = [1, 1]} : vector<8x96xf32> to vector<8x8xf32>
    %cst_13 = arith.constant 0.353553385 : f32
    %26 = vector.broadcast %cst_13 : f32 to vector<8x8xf32>
    %27 = arith.mulf %25, %26 : vector<8x8xf32>
    %28 = vector.extract_strided_slice %6 {offsets = [0, 32], sizes = [8, 8], strides = [1, 1]} : vector<8x96xf32> to vector<8x8xf32>
    %29 = vector.extract_strided_slice %6 {offsets = [0, 40], sizes = [8, 8], strides = [1, 1]} : vector<8x96xf32> to vector<8x8xf32>
    %cst_14 = arith.constant dense<0.000000e+00> : vector<8x8xf32>
    %30 = tpu.matmul %27, %28, %cst_14 {dimension_numbers = #tpu.dot_dimension_numbers<[1], [1], [0], [0], [0, 0, 1, 0], [], []>} : vector<8x8xf32>, vector<8x8xf32>, vector<8x8xf32> -> vector<8x8xf32>
    %cst_15 = arith.constant dense<0xFF800000> : vector<8xf32>
    %31 = vector.multi_reduction <maximumf>, %30, %cst_15 [1] : vector<8x8xf32> to vector<8xf32>
    %32 = vector.shape_cast %31 : vector<8xf32> to vector<8x1xf32>
    %33 = vector.broadcast %32 : vector<8x1xf32> to vector<8x8xf32>
    %34 = arith.subf %30, %33 : vector<8x8xf32>
    %35 = math.exp %34 : vector<8x8xf32>
    %cst_16 = arith.constant dense<0.000000e+00> : vector<8xf32>
    %36 = vector.multi_reduction <add>, %35, %cst_16 [1] : vector<8x8xf32> to vector<8xf32>
    %37 = vector.shape_cast %36 : vector<8xf32> to vector<8x1xf32>
    %38 = tpu.reciprocal %37 {approx = true} : vector<8x1xf32> -> vector<8x1xf32>
    %39 = vector.broadcast %38 : vector<8x1xf32> to vector<8x8xf32>
    %40 = arith.mulf %35, %39 : vector<8x8xf32>
    %cst_17 = arith.constant dense<0.000000e+00> : vector<8x8xf32>
    %41 = tpu.matmul %40, %29, %cst_17 {dimension_numbers = #tpu.dot_dimension_numbers<[1], [0], [0], [1], [0, 0, 1, 1], [], []>} : vector<8x8xf32>, vector<8x8xf32>, vector<8x8xf32> -> vector<8x8xf32>
    %c0_18 = arith.constant 0 : index
    %c8 = arith.constant 8 : index
    %42 = vector.load %arg7[%c0_18, %c8] : memref<8x32xf32, #tpu.memory_space<vmem>>, vector<8x8xf32>
    tpu.vector_store %arg7[%c0_18, %c8], %41 {strides = array<i32>} : memref<8x32xf32, #tpu.memory_space<vmem>>, vector<8x8xf32>,
    %43 = vector.extract_strided_slice %6 {offsets = [0, 48], sizes = [8, 8], strides = [1, 1]} : vector<8x96xf32> to vector<8x8xf32>
    %cst_19 = arith.constant 0.353553385 : f32
    %44 = vector.broadcast %cst_19 : f32 to vector<8x8xf32>
    %45 = arith.mulf %43, %44 : vector<8x8xf32>
    %46 = vector.extract_strided_slice %6 {offsets = [0, 56], sizes = [8, 8], strides = [1, 1]} : vector<8x96xf32> to vector<8x8xf32>
    %47 = vector.extract_strided_slice %6 {offsets = [0, 64], sizes = [8, 8], strides = [1, 1]} : vector<8x96xf32> to vector<8x8xf32>
    %cst_20 = arith.constant dense<0.000000e+00> : vector<8x8xf32>
    %48 = tpu.matmul %45, %46, %cst_20 {dimension_numbers = #tpu.dot_dimension_numbers<[1], [1], [0], [0], [0, 0, 1, 0], [], []>} : vector<8x8xf32>, vector<8x8xf32>, vector<8x8xf32> -> vector<8x8xf32>
    %cst_21 = arith.constant dense<0xFF800000> : vector<8xf32>
    %49 = vector.multi_reduction <maximumf>, %48, %cst_21 [1] : vector<8x8xf32> to vector<8xf32>
    %50 = vector.shape_cast %49 : vector<8xf32> to vector<8x1xf32>
    %51 = vector.broadcast %50 : vector<8x1xf32> to vector<8x8xf32>
    %52 = arith.subf %48, %51 : vector<8x8xf32>
    %53 = math.exp %52 : vector<8x8xf32>
    %cst_22 = arith.constant dense<0.000000e+00> : vector<8xf32>
    %54 = vector.multi_reduction <add>, %53, %cst_22 [1] : vector<8x8xf32> to vector<8xf32>
    %55 = vector.shape_cast %54 : vector<8xf32> to vector<8x1xf32>
    %56 = tpu.reciprocal %55 {approx = true} : vector<8x1xf32> -> vector<8x1xf32>
    %57 = vector.broadcast %56 : vector<8x1xf32> to vector<8x8xf32>
    %58 = arith.mulf %53, %57 : vector<8x8xf32>
    %cst_23 = arith.constant dense<0.000000e+00> : vector<8x8xf32>
    %59 = tpu.matmul %58, %47, %cst_23 {dimension_numbers = #tpu.dot_dimension_numbers<[1], [0], [0], [1], [0, 0, 1, 1], [], []>} : vector<8x8xf32>, vector<8x8xf32>, vector<8x8xf32> -> vector<8x8xf32>
    %c0_24 = arith.constant 0 : index
    %c16 = arith.constant 16 : index
    %60 = vector.load %arg7[%c0_24, %c16] : memref<8x32xf32, #tpu.memory_space<vmem>>, vector<8x8xf32>
    tpu.vector_store %arg7[%c0_24, %c16], %59 {strides = array<i32>} : memref<8x32xf32, #tpu.memory_space<vmem>>, vector<8x8xf32>,
    %61 = vector.extract_strided_slice %6 {offsets = [0, 72], sizes = [8, 8], strides = [1, 1]} : vector<8x96xf32> to vector<8x8xf32>
    %cst_25 = arith.constant 0.353553385 : f32
    %62 = vector.broadcast %cst_25 : f32 to vector<8x8xf32>
    %63 = arith.mulf %61, %62 : vector<8x8xf32>
    %64 = vector.extract_strided_slice %6 {offsets = [0, 80], sizes = [8, 8], strides = [1, 1]} : vector<8x96xf32> to vector<8x8xf32>
    %65 = vector.extract_strided_slice %6 {offsets = [0, 88], sizes = [8, 8], strides = [1, 1]} : vector<8x96xf32> to vector<8x8xf32>
    %cst_26 = arith.constant dense<0.000000e+00> : vector<8x8xf32>
    %66 = tpu.matmul %63, %64, %cst_26 {dimension_numbers = #tpu.dot_dimension_numbers<[1], [1], [0], [0], [0, 0, 1, 0], [], []>} : vector<8x8xf32>, vector<8x8xf32>, vector<8x8xf32> -> vector<8x8xf32>
    %cst_27 = arith.constant dense<0xFF800000> : vector<8xf32>
    %67 = vector.multi_reduction <maximumf>, %66, %cst_27 [1] : vector<8x8xf32> to vector<8xf32>
    %68 = vector.shape_cast %67 : vector<8xf32> to vector<8x1xf32>
    %69 = vector.broadcast %68 : vector<8x1xf32> to vector<8x8xf32>
    %70 = arith.subf %66, %69 : vector<8x8xf32>
    %71 = math.exp %70 : vector<8x8xf32>
    %cst_28 = arith.constant dense<0.000000e+00> : vector<8xf32>
    %72 = vector.multi_reduction <add>, %71, %cst_28 [1] : vector<8x8xf32> to vector<8xf32>
    %73 = vector.shape_cast %72 : vector<8xf32> to vector<8x1xf32>
    %74 = tpu.reciprocal %73 {approx = true} : vector<8x1xf32> -> vector<8x1xf32>
    %75 = vector.broadcast %74 : vector<8x1xf32> to vector<8x8xf32>
    %76 = arith.mulf %71, %75 : vector<8x8xf32>
    %cst_29 = arith.constant dense<0.000000e+00> : vector<8x8xf32>
    %77 = tpu.matmul %76, %65, %cst_29 {dimension_numbers = #tpu.dot_dimension_numbers<[1], [0], [0], [1], [0, 0, 1, 1], [], []>} : vector<8x8xf32>, vector<8x8xf32>, vector<8x8xf32> -> vector<8x8xf32>
    %c0_30 = arith.constant 0 : index
    %c24 = arith.constant 24 : index
    %78 = vector.load %arg7[%c0_30, %c24] : memref<8x32xf32, #tpu.memory_space<vmem>>, vector<8x8xf32>
    tpu.vector_store %arg7[%c0_30, %c24], %77 {strides = array<i32>} : memref<8x32xf32, #tpu.memory_space<vmem>>, vector<8x8xf32>,
    %c0_31 = arith.constant 0 : index
    %c0_32 = arith.constant 0 : index
    %79 = vector.load %arg7[%c0_31, %c0_32] : memref<8x32xf32, #tpu.memory_space<vmem>>, vector<8x32xf32>
    %c0_33 = arith.constant 0 : index
    %c0_34 = arith.constant 0 : index
    %80 = vector.load %arg4[%c0_33, %c0_34] : memref<32x32xf32, #tpu.memory_space<vmem>>, vector<32x32xf32>
    %cst_35 = arith.constant dense<0.000000e+00> : vector<8x32xf32>
    %81 = tpu.matmul %79, %80, %cst_35 {dimension_numbers = #tpu.dot_dimension_numbers<[1], [0], [0], [1], [0, 0, 1, 1], [], []>} : vector<8x32xf32>, vector<32x32xf32>, vector<8x32xf32> -> vector<8x32xf32>
    %c0_36 = arith.constant 0 : index
    %c0_37 = arith.constant 0 : index
    %82 = vector.load %arg5[%c0_36, %c0_37] : memref<1x32xf32, #tpu.memory_space<vmem>>, vector<1x32xf32>
    %83 = vector.broadcast %82 : vector<1x32xf32> to vector<8x32xf32>
    %84 = arith.addf %81, %83 : vector<8x32xf32>
    %c0_38 = arith.constant 0 : index
    %c0_39 = arith.constant 0 : index
    %c0_40 = arith.constant 0 : index
    %85 = vector.load %arg6[%c0_38, %c0_39, %c0_40] : memref<1x8x32xf32, #tpu.memory_space<vmem>>, vector<1x8x32xf32>
    %86 = vector.shape_cast %85 : vector<1x8x32xf32> to vector<8x32xf32>
    %87 = vector.shape_cast %84 : vector<8x32xf32> to vector<1x8x32xf32>
    tpu.vector_store %arg6[%c0_38, %c0_39, %c0_40], %87 {strides = array<i32>} : memref<1x8x32xf32, #tpu.memory_space<vmem>>, vector<1x8x32xf32>,
    return
  }
  func.func @transform_0(%arg0: i32) -> (i32, i32, i32) {
    %c0_i32 = arith.constant 0 : i32
    %c0_i32_0 = arith.constant 0 : i32
    %c0_i32_1 = arith.constant 0 : i32
    return %arg0, %c0_i32, %c0_i32_0 : i32, i32, i32
  }
  func.func @transform_1(%arg0: i32) -> (i32, i32) {
    %c0_i32 = arith.constant 0 : i32
    %c0_i32_0 = arith.constant 0 : i32
    %c0_i32_1 = arith.constant 0 : i32
    return %c0_i32, %c0_i32_0 : i32, i32
  }
  func.func @transform_2(%arg0: i32) -> (i32, i32) {
    %c0_i32 = arith.constant 0 : i32
    %c0_i32_0 = arith.constant 0 : i32
    %c0_i32_1 = arith.constant 0 : i32
    return %c0_i32, %c0_i32_0 : i32, i32
  }
  func.func @transform_3(%arg0: i32) -> (i32, i32) {
    %c0_i32 = arith.constant 0 : i32
    %c0_i32_0 = arith.constant 0 : i32
    %c0_i32_1 = arith.constant 0 : i32
    return %c0_i32, %c0_i32_0 : i32, i32
  }
  func.func @transform_4(%arg0: i32) -> (i32, i32) {
    %c0_i32 = arith.constant 0 : i32
    %c0_i32_0 = arith.constant 0 : i32
    %c0_i32_1 = arith.constant 0 : i32
    return %c0_i32, %c0_i32_0 : i32, i32
  }
  func.func @transform_5(%arg0: i32) -> (i32, i32, i32) {
    %c0_i32 = arith.constant 0 : i32
    %c0_i32_0 = arith.constant 0 : i32
    %c0_i32_1 = arith.constant 0 : i32
    return %arg0, %c0_i32, %c0_i32_0 : i32, i32, i32
  }
}

</mosaic_0001>

<bundles_post_ra>
// kernel: self_attention_forward.1
= control target key start
LH: loop header
LB: loop body
LE: loop exit
PB: predicated region body
PF: predicated region fallthrough
CT: control target
= control target key end

     0   :  { %10 = vsyncpa [#allocation4], 0  ;;  %s1976_s0 = inlined_call_operand.hbm [shape: f32[2,8,32], index: 0, kind: input, shape index: {}]   ;;  %s1977_s1 = inlined_call_operand.hbm [shape: f32[32,96], index: 1, kind: input, shape index: {}]   ;;  %s1978_s2 = inlined_call_operand.vmem [shape: f32[1,96], index: 2, kind: input, shape index: {}]   ;;  %s1979_s3 = inlined_call_operand.hbm [shape: f32[32,32], index: 3, kind: input, shape index: {}]   ;;  %s1980_s4 = inlined_call_operand.vmem [shape: f32[1,32], index: 4, kind: input, shape index: {}]   ;;  %s1981_s5 = inlined_call_operand.hbm [shape: f32[2,8,32], index: 5, kind: output, shape index: {}]  }
   0x1   :  { %12 = vsyncpa [#allocation4 + $0x1], 0 }
   0x2   :  { %13 = vsyncpa [#allocation7], 0 }
   0x3   :  { %14 = vsyncpa [#allocation5], 0 }
   0x4   :  { %16 = vsyncpa [#allocation5 + $0x1], 0  ;;  %s1670_s18 = smov 0   ;;  %s1672_s19 = smov 0  }
   0x5   :  { %s1674_s20 = smov 0   ;;  %s1676_s21 = smov 0  }
   0x6 LB: > { %s1691_s22 = sadd.s32 4294967295, %s1615_s21   ;;  %s1225_s23 = sadd.s32 4294967294, %s1615_s21   ;;  %s1615_s21 = sphi %s1676_s21, %s2001_s21   ;;  %s1611_s20 = sphi %s1674_s20, %s2000_s20   ;;  %s1607_s19 = sphi %s1672_s19, %s1999_s19   ;;  %s1603_s18 = sphi %s1670_s18, %s1998_s18  }
   0x7   : > { %p42_p0 = scmp.ne.s32.totalorder %s1607_s19, %s1603_s18  ;;  %p1982_p1 = scmp.eq.s32.totalorder %s1691_s22, 0 }
   0x8   : > { %p156_p3 = scmp.eq.s32.totalorder %s1225_s23, 1  ;;  %p1226_p5 = scmp.ge.s32.totalorder %s1615_s21, 1 }
   0x9   : > { %p1700_p4 = por %p1982_p1, %p42_p0  ;;  %p163_p7 = scmp.lt.s32.totalorder %s1615_s21, 3 }
   0xa   : > { %p1705_p6 = por %p156_p3, %p42_p0  ;;  %s1617_s27 = smov [#allocation6]  }
   0xb   : > { %s1985_s24 = scalar_select %p1700_p4, 1, 0 }
   0xc   : > { %s1986_s25 = scalar_select %p1705_p6, 1, 0 }
   0xd   : > { %p1710_p8 = pnand %p1226_p5, %p163_p7  ;;  %s175_s28 = sshll.u32 %s1617_s27, 4  ;;  %s1714_s28 = int_to_ptr.vmem [resolvable:$true] %s175_s28 }
   0xe   : > { %s1618_s30 = smov [#allocation8]   ;;  %s1459_s9 = scalar_lea.hbm %s1977_s1, 512 }
   0xf   : > { %p1369_p9 = pneg %p1710_p8  ;;  %s191_s6 = sshll.u32 %s1618_s30, 4  ;;  %s1725_s6 = int_to_ptr.vmem [resolvable:$true] %s191_s6 }
  0x10   : > { %p1460_p12 = scmp.ne.s32.totalorder %s1977_s1, %s1459_s9  ;;  %p1466_p5 = scmp.lt.u32.totalorder %s1459_s9, %s1977_s1 }
  0x11   : > { %p1721_p11 = pnand %p1369_p9, %p1982_p1 }
  0x13   : > { %p1461_p13 = pneg %p1721_p11 }
  0x15   : > { %p1462_p0 = pnand %p1461_p13, %p1460_p12 }
  0x17   : > { %p1463_p3 = pneg %p1462_p0 }
  0x19   : > { %p1468_p7 = pnand %p1466_p5, %p1463_p3 }
  0x1b   : > { %1471 = shalt.err (!%p1468_p7)
}
  0x1c   : > { %s1472_s14 = scalar_lea.vmem %s1714_s28, 512  ;;  %p1480_p2 = scmp.lt.s32.totalorder %s1714_s28, %s1714_s28 }
  0x1d   : > { %p1473_p9 = scmp.ne.s32.totalorder %s1714_s28, %s1472_s14  ;;  %p1481_p12 = scmp.lt.s32.totalorder %s1472_s14, %s1472_s14 }
  0x1f   : > { %p1475_p10 = pnand %p1473_p9, %p1461_p13  ;;  %p1482_p0 = por %p1481_p12, %p1480_p2 }
  0x21   : > { %p1476_p1 = pneg %p1475_p10 }
  0x23   : > { %p1483_p6 = pnand %p1482_p0, %p1476_p1 }
  0x25   : > { %1486 = shalt.err (!%p1483_p6)
}
  0x26   : > { %s1619_s15 = smov 128   ;;  %s1620_s16 = smov 8  }
  0x27   : > { %1372 = dma.hbm_to_vmem [thread:$0]  (!%p1721_p11), %s1977_s1, 512, %s1714_s28, [#allocation7], %s1619_s15, %s1619_s15, %s1620_s16  }
  0x28   : > { %s1487_s7 = scalar_lea.hbm %s1979_s3, 512 }
  0x29   : > { %p1488_p2 = scmp.ne.s32.totalorder %s1979_s3, %s1487_s7  ;;  %p1494_p10 = scmp.lt.u32.totalorder %s1487_s7, %s1979_s3 }
  0x2b   : > { %p1490_p1 = pnand %p1488_p2, %p1461_p13 }
  0x2d   : > { %p1491_p6 = pneg %p1490_p1 }
  0x2f   : > { %p1496_p3 = pnand %p1494_p10, %p1491_p6 }
  0x31   : > { %1499 = shalt.err (!%p1496_p3)
}
  0x32   : > { %s1500_s28 = scalar_lea.vmem %s1725_s6, 512  ;;  %p1508_p12 = scmp.lt.s32.totalorder %s1725_s6, %s1725_s6 }
  0x33   : > { %p1501_p5 = scmp.ne.s32.totalorder %s1725_s6, %s1500_s28  ;;  %p1509_p0 = scmp.lt.s32.totalorder %s1500_s28, %s1500_s28 }
  0x35   : > { %p1503_p7 = pnand %p1501_p5, %p1461_p13  ;;  %p1510_p2 = por %p1509_p0, %p1508_p12 }
  0x37   : > { %p1504_p9 = pneg %p1503_p7 }
  0x39   : > { %p1511_p1 = pnand %p1510_p2, %p1504_p9 }
  0x3b   : > { %1514 = shalt.err (!%p1511_p1)
}
  0x3c   : > { %1375 = dma.hbm_to_vmem [thread:$0]  (!%p1721_p11), %s1979_s3, 512, %s1725_s6, [#allocation7], %s1619_s15, %s1619_s15, %s1620_s16  }
  0x3d   : > { %s1780_s14 = sadd.s32 1, %s1615_s21   ;;  %s29_s29 = sadd.s32 1, %s1611_s20 }
  0x3e   : > { %s26_s17 = ssub.s32 %s1615_s21, %s1780_s14  ;;  %p36_p13 = scmp.ne.s32.totalorder %s1611_s20, %s1607_s19 }
  0x3f   : > { %p27_p6 = scmp.eq.s32.totalorder %s26_s17, 0  ;;  %p37_p10 = scmp.eq.s32.totalorder %s1615_s21, 0 }
  0x40   : > { %p1989_p3 = scmp.eq.s32.totalorder %s1691_s22, 1  ;;  %p1386_p7 = scmp.lt.s32.totalorder %s1615_s21, 2 }
  0x41   : > { %s1796_s27 = scalar_select %p27_p6, %s1611_s20, %s29_s29  }
  0x42   : > { %p1790_p5 = por %p1989_p3, %p36_p13  ;;  %p38_p9 = por %p37_p10, %p36_p13 }
  0x43   : > { %s208_s30 = sand.u32 1, %s1611_s20   ;;  %s1231_s6 = sshll.u32 %s1615_s21, 7 }
  0x44   : > { %s1990_s23 = scalar_select %p1790_p5, 1, 0 }
  0x45   : > { %s1230_s7 = sshll.u32 %s208_s30, 3  ;;  %s1803_s8 = scalar_lea.hbm %s1976_s0, %s1231_s6 }
  0x46   : > { %s212_s9 = scalar_lea.vmem [#allocation3], %s1230_s7  ;;  %p1807_p11 = pnand %p1386_p7, %p38_p9 }
  0x47   : > { %s219_s10 = sshll.u32 %s212_s9, 4  ;;  %s209_s28 = scalar_lea.sflag [#allocation4], %s208_s30  ;;  %s1805_s10 = int_to_ptr.vmem [resolvable:$true] %s219_s10 }
  0x48   : > { %s1515_s12 = scalar_lea.hbm %s1803_s8, 128  ;;  %p1517_p0 = pneg %p1807_p11 }
  0x49   : > { %p1516_p12 = scmp.ne.s32.totalorder %s1803_s8, %s1515_s12  ;;  %s1520_s17 = scalar_lea.hbm %s1976_s0, 256 }
  0x4a   : > { %p1521_p13 = scmp.lt.u32.totalorder %s1803_s8, %s1976_s0  ;;  %p1522_p6 = scmp.lt.u32.totalorder %s1520_s17, %s1515_s12 }
  0x4b   : > { %p1518_p2 = pnand %p1517_p0, %p1516_p12  ;;  %p1524_p3 = scmp.lt.u32.totalorder %s1515_s12, %s1803_s8 }
  0x4c   : > { %p1523_p10 = por %p1522_p6, %p1521_p13 }
  0x4d   : > { %p1519_p1 = pneg %p1518_p2 }
  0x4e   : > { %p1525_p7 = por %p1524_p3, %p1523_p10 }
  0x50   : > { %p1526_p9 = pnand %p1525_p7, %p1519_p1 }
  0x52   : > { %1529 = shalt.err (!%p1526_p9)
}
  0x53   : > { %s1530_s30 = scalar_lea.vmem %s1805_s10, 128  ;;  %s1621_s15 = smov [#allocation3]  }
  0x54   : > { %p1531_p12 = scmp.ne.s32.totalorder %s1805_s10, %s1530_s30  ;;  %s1535_s16 = sshll.u32 %s1621_s15, 4  ;;  %s1536_s16 = int_to_ptr.vmem [resolvable:$false] %s1535_s16 }
  0x55   : > { %s1537_s9 = scalar_lea.vmem %s1536_s16, 256  ;;  %p1538_p4 = scmp.lt.s32.totalorder %s1805_s10, %s1536_s16 }
  0x56   : > { %p1533_p2 = pnand %p1531_p12, %p1517_p0  ;;  %p1539_p13 = scmp.lt.s32.totalorder %s1537_s9, %s1530_s30 }
  0x58   : > { %p1534_p5 = pneg %p1533_p2  ;;  %p1540_p6 = por %p1539_p13, %p1538_p4 }
  0x5a   : > { %p1541_p10 = pnand %p1540_p6, %p1534_p5 }
  0x5c   : > { %1544 = shalt.err (!%p1541_p10)
}
  0x5d   : > { %1379 = dma.hbm_to_vmem [thread:$0]  (!%p1807_p11), %s1803_s8, 128, %s1805_s10, %s209_s28  }
  0x5e   : > { %228 = sbr.rel (%p1710_p8) target bundleno = 2114 (0x842), region = 40  ;;  %s1839_s12 = sand.u32 (!%p1710_p8), 1, %s1607_s19  }
  0x5f   : > { %s1233_s13 = sshll.u32 (!%p1710_p8), %s1839_s12, 3  ;;  %s231_s29 = scalar_lea.sflag (!%p1710_p8), [#allocation4], %s1839_s12 }
  0x60   : > { %s234_s17 = scalar_lea.vmem (!%p1710_p8), [#allocation3], %s1233_s13  ;;  %p1992_p4 = scmp.ne.s32.totalorder (!%p1710_p8), %s1985_s24, 0 }
  0x65   : > { %1590 = dma.done.wait (%p1992_p4), %s231_s29, 128  }
  0x66   : > { %1592 = vsyncadd (%p1992_p4), %s231_s29, 4294967168  ;;  %p1993_p5 = scmp.eq.s32.totalorder %s1691_s22, 0 }
  0x68   : > { %1594 = dma.done.wait (%p1993_p5), [#allocation7], 1024   ;;  %p1994_p8 = pmov %p1993_p5 }
  0x69   : > { %v1622_v0 = vmov 0.0|0.0   ;;  %vm1623_vm0 = vmmov 0   ;;  %v1624_v1 = vmov 0.0   ;;  %v270_v2 = vld [vmem:[#allocation6] sm:$0xff]  ;;  %v271_v3 = vld [vmem:[#allocation6 + $0x8] sm:$0xff]  ;;  %v272_v4 = vld [vmem:[#allocation6 + $0x10] sm:$0xff] }
  0x6a   : > { %1596 = vsyncadd (%p1994_p8), [#allocation7], 4294966272  ;;  %1345 = vmatprep.subr.bf16.mxu0 %v1622_v0  ;;  %1291 = vmatprep.mubr.msk.f32.mxu0 %vm1623_vm0, %v1624_v1  ;;  %v1346_v5 = vpack.c.bf16 %v271_v3, %v270_v2  ;;  %v273_v6 = vld [vmem:[#allocation6 + $0x18] sm:$0xff]  ;;  %vm281_vm1 = vcmask 261120   ;;  %v1237_v9 = vld [vmem:[%s1978_s2] ss:$0 sm:$0xff] }
  0x6b   : > { %1294 = vmatprep.subr.mxu1 %v1624_v1  ;;  %1296 = vmatprep.mubr.msk.f32.mxu1 %vm1623_vm0, %v1624_v1  ;;  %v1349_v7 = vpack.c.bf16 %v273_v6, %v272_v4  ;;  %v269_v8 = vld [vmem:[%s234_s17] sm:$0xff]  ;;  %s1625_s8 = smov 112   ;;  %s1626_s10 = smov 120   ;;  %vm359_vm2 = vcmask 64512   ;;  %vm692_vm3 = vcmask 130112   ;;  %vm863_vm4 = vcmask 195712  }
  0x6c   : > { %1347 = vmatpush3.bf16.msra.mxu0 %v1346_v5  ;;  %s1627_s11 = smov 96   ;;  %s1628_s28 = smov 104   ;;  %vm1034_vm5 = vcmask 261312  }
  0x6d   : > { %1348 = vmatprep.subr.bf16.mxu0 %v1622_v0  ;;  %s1629_s7 = smov 72   ;;  %s1630_s6 = smov 48  }
  0x6e   : > { %s1631_s30 = smov 80   ;;  %s1632_s15 = smov 56  }
  0x6f   : > { %s1633_s16 = smov 88   ;;  %s1634_s9 = smov 64  }
  0x70   : > { %1350 = vmatpush3.bf16.msra.mxu0 %v1349_v7  ;;  %s1635_s29 = smov 40   ;;  %s1636_s17 = smov 8  }
  0x71   : > { %1314 = vmatprep.subr.mxu0 %v1624_v1  ;;  %s1637_s24 = smov 16   ;;  %s1638_s26 = smov 24  }
  0x72   : > { %p1995_p0 = scmp.ne.s32.totalorder %s1990_s23, 0 }
  0x73   : > { %1292 = vmatmul.mubr.msk.f32.vlgmr.msra.gmra.mrb[0].mxu0 %vm281_vm1, %v269_v8 }
  0x74   : > { %1316 = vmatprep.mubr.msk.f32.mxu0 %vm1623_vm0, %v1624_v1 }
 0x146   : > { %v351_v10 = vpop.f32.mrb[0].mxu0 }
 0x147   : > { %v1867_v11 = vadd.f32 %v1237_v9, %v351_v10  ;;  %v1293_v12 = vpop.f32.mrb[1].mxu0  ;;  %v1037_v9 = vld [vmem:[#allocation8] sm:$0xff]  ;;  %v1038_v10 = vld [vmem:[#allocation8 + $0x8] sm:$0xff] }
 0x148   : > { %v1039_v12 = vld [vmem:[#allocation8 + $0x10] sm:$0xff] }
 0x149   : > { %446 = vrot.lane.b32.xlu1 %v1867_v11, %s1625_s8  ;;  %357 = vrot.lane.b32.xlu0 %v1867_v11, %s1626_s10  ;;  %v355_v13 = vmul.f32 0.35355338, %v1867_v11 }
 0x14d   : > { %525 = vrot.lane.b32.xlu1 %v1867_v11, %s1627_s11  ;;  %s1254_s11 = sshll.u32 %s1691_s22, 7 }
 0x151   : > { %523 = vrot.lane.b32.xlu1 %v355_v13, %s1628_s28  ;;  %s268_s28 = scalar_lea.vmem [#allocation9], %s1233_s13  ;;  %s1639_s13 = smov [#allocation9]  }
 0x155   : > { %696 = vrot.lane.b32.xlu1 %v1867_v11, %s1629_s7  ;;  %s1136_s7 = sshll.u32 %s268_s28, 4  ;;  %s1933_s7 = int_to_ptr.vmem [resolvable:$true] %s1136_s7 }
 0x156   : > { %s1545_s22 = scalar_lea.vmem %s1933_s7, 128 }
 0x157   : > { %p1546_p11 = scmp.ne.s32.totalorder %s1933_s7, %s1545_s22 }
 0x159   : > { %p1547_p1 = pnand %p1546_p11, %p1995_p0 }
 0x15b   : > { %p1548_p3 = pneg %p1547_p1 }
 0x1bb   : > { %v447_v14 = vpop.permute.xlu1 %446  ;;  %v358_v15 = vpop.permute.xlu0 %357 }
 0x1bc   : > { %1295 = vmatpush3.xpose.msk.msra.mxu1 %vm359_vm2, %v358_v15 }
 0x1bd   : > { %1299 = vmatprep.subr.mxu1 %v1624_v1 }
 0x1bf   : > { %v526_v16 = vpop.permute.xlu1 %525  ;;  %1297 = vmatmul.mubr.msk.f32.vlgmr.msra.gmra.mrb[0].mxu1 %vm359_vm2, %v355_v13 }
 0x1c0   : > { %1300 = vmatpush3.msra.mxu1 %v447_v14  ;;  %1301 = vmatprep.mubr.msk.f32.mxu1 %vm1623_vm0, %v1624_v1 }
 0x1c1   : > { %1304 = vmatprep.subr.mxu1 %v1624_v1 }
 0x1c3   : > { %v524_v17 = vpop.permute.xlu1 %523 }
 0x1c7   : > { %v697_v18 = vpop.permute.xlu1 %696 }
 0x1c8   : > { %1315 = vmatpush3.xpose.msk.msra.mxu0 %vm359_vm2, %v697_v18 }
 0x1c9   : > { %1324 = vmatprep.subr.mxu0 %v1624_v1 }
 0x292   : > { %v431_v19 = vpop.f32.mrb[0].mxu1 }
 0x293   : > { %v1298_v20 = vpop.f32.mrb[1].mxu1  ;;  %v435_v21 = vsel %vm359_vm2, %v431_v19, -inf }
 0x294   : > { %436 = vmax.xlane.f32.xlu0 %v435_v21 }
 0x2aa   : > { %867 = vrot.lane.b32.xlu0 %v1867_v11, %s1630_s6 }
 0x321   : > { %v437_v22 = vpop.xlane.xlu0 %436 }
 0x322   : > { %v438_v23 = vsub.f32 %v431_v19, %v437_v22 }
 0x324   : > { %v439_v24 = vmul.f32 1.442695, %v438_v23  ;;  %v1251_v23 = vld [vmem:[%s1980_s4] ss:$0 sm:$0xff] }
 0x325   : > { %v868_v29 = vpop.permute.xlu0 %867 }
 0x326   : > { %1443 = vpow2.f32 %v439_v24 }
 0x330   : > { %v1444_v25 = vpop.eup %1443 }
 0x331   : > { %v441_v26 = vsel %vm359_vm2, %v1444_v25, 0.0 }
 0x332   : > { %442 = vadd.xlane.f32.xlu1 %v441_v26 }
 0x343   : > { %694 = vrot.lane.b32.xlu1 %v355_v13, %s1631_s30 }
 0x347   : > { %865 = vrot.lane.b32.xlu1 %v355_v13, %s1632_s15  ;;  %v1040_v13 = vld [vmem:[#allocation8 + $0x18] sm:$0xff]  ;;  %s1931_s15 = scalar_lea.hbm %s1981_s5, %s1254_s11 }
 0x348   : > { %v1355_v14 = vpack.c.bf16 %v1040_v13, %v1039_v12 }
 0x3bf   : > { %v443_v27 = vpop.xlane.xlu1 %442 }
 0x3c0   : > { %1445 = vrcp.f32 %v443_v27 }
 0x3c3   : > { %v695_v28 = vpop.permute.xlu1 %694 }
 0x3c4   : > { %1317 = vmatmul.mubr.msk.f32.vlgmr.msra.gmra.mrb[2].mxu0 %vm359_vm2, %v695_v28 }
 0x3c5   : > { %1325 = vmatpush3.xpose.msk.msra.mxu0 %vm359_vm2, %v868_v29  ;;  %1326 = vmatprep.mubr.msk.f32.mxu0 %vm1623_vm0, %v1624_v1 }
 0x3c6   : > { %1351 = vmatprep.subr.bf16.mxu0 %v1622_v0 }
 0x3c7   : > { %v866_v30 = vpop.permute.xlu1 %865 }
 0x3c8   : > { %1327 = vmatmul.mubr.msk.f32.vlgmr.msra.gmra.mrb[4].mxu0 %vm359_vm2, %v866_v30 }
 0x3c9   : > { %1342 = vmatprep.mubr.msk.f32.mxu0 %vm1623_vm0, %v1624_v1 }
 0x3ca   : > { %v1446_v31 = vpop.eup %1445 }
 0x3cb   : > { %v445_v32 = vmul.f32 %v1446_v31, %v1444_v25 }
 0x3cd   : > { %1302 = vmatmul.mubr.msk.f32.vlgmr.msra.gmra.mrb[2].mxu1 %vm359_vm2, %v445_v32 }
 0x3ce   : > { %1305 = vmatpush3.xpose.msk.msra.mxu1 %vm359_vm2, %v526_v16  ;;  %1306 = vmatprep.mubr.msk.f32.mxu1 %vm1623_vm0, %v1624_v1 }
 0x3cf   : > { %1309 = vmatprep.subr.mxu1 %v1624_v1 }
 0x3d1   : > { %1307 = vmatmul.mubr.msk.f32.vlgmr.msra.gmra.mrb[4].mxu1 %vm359_vm2, %v524_v17 }
 0x3d2   : > { %1311 = vmatprep.mubr.msk.f32.mxu1 %vm1623_vm0, %v1624_v1 }
 0x497   : > { %v768_v33 = vpop.f32.mrb[2].mxu0 }
 0x498   : > { %v1318_v34 = vpop.f32.mrb[3].mxu0  ;;  %v772_v35 = vsel %vm359_vm2, %v768_v33, -inf }
 0x499   : > { %773 = vmax.xlane.f32.xlu0 %v772_v35 }
 0x49b   : > { %v939_v36 = vpop.f32.mrb[4].mxu0 }
 0x49c   : > { %v1328_v37 = vpop.f32.mrb[5].mxu0  ;;  %v943_v43 = vsel %vm359_vm2, %v939_v36, -inf }
 0x4a0   : > { %v518_v38 = vpop.f32.mrb[2].mxu1 }
 0x4a1   : > { %522 = vst.msk [vmem:[#allocation2] sm:$0xff] %vm359_vm2, %v518_v38  ;;  %v1303_v39 = vpop.f32.mrb[3].mxu1 }
 0x4a4   : > { %v597_v40 = vpop.f32.mrb[4].mxu1 }
 0x4a5   : > { %v1308_v41 = vpop.f32.mrb[5].mxu1  ;;  %v601_v42 = vsel %vm359_vm2, %v597_v40, -inf }
 0x4a6   : > { %602 = vmax.xlane.f32.xlu1 %v601_v42 }
 0x4aa   : > { %944 = vmax.xlane.f32.xlu1 %v943_v43 }
 0x526   : > { %v774_v44 = vpop.xlane.xlu0 %773 }
 0x527   : > { %v775_v45 = vsub.f32 %v768_v33, %v774_v44 }
 0x529   : > { %v776_v46 = vmul.f32 1.442695, %v775_v45 }
 0x52b   : > { %1447 = vpow2.f32 %v776_v46 }
 0x533   : > { %v603_v47 = vpop.xlane.xlu1 %602 }
 0x534   : > { %v604_v55 = vsub.f32 %v597_v40, %v603_v47 }
 0x535   : > { %v1448_v48 = vpop.eup %1447 }
 0x536   : > { %v778_v49 = vsel %vm359_vm2, %v1448_v48, 0.0  ;;  %v605_v56 = vmul.f32 1.442695, %v604_v55 }
 0x537   : > { %779 = vadd.xlane.f32.xlu1 %v778_v49  ;;  %v945_v50 = vpop.xlane.xlu1 %944 }
 0x538   : > { %v946_v51 = vsub.f32 %v939_v36, %v945_v50 }
 0x53a   : > { %v947_v52 = vmul.f32 1.442695, %v946_v51 }
 0x53c   : > { %1449 = vpow2.f32 %v947_v52 }
 0x53d   : > { %1451 = vpow2.f32 %v605_v56 }
 0x546   : > { %v1450_v53 = vpop.eup %1449 }
 0x547   : > { %v949_v54 = vsel %vm359_vm2, %v1450_v53, 0.0  ;;  %v1452_v57 = vpop.eup %1451 }
 0x548   : > { %612 = vrot.lane.b32.xlu1 %v1867_v11, %s1633_s16  ;;  %950 = vadd.xlane.f32.xlu0 %v949_v54  ;;  %v607_v58 = vsel %vm359_vm2, %v1452_v57, 0.0  ;;  %s1123_s16 = scalar_lea.sflag [#allocation5], %s1839_s12 }
 0x55e   : > { %783 = vrot.lane.b32.xlu0 %v1867_v11, %s1634_s9  ;;  %s1549_s9 = sshll.u32 %s1639_s13, 4  ;;  %s1550_s9 = int_to_ptr.vmem [resolvable:$false] %s1549_s9 }
 0x55f   : > { %p1552_p7 = scmp.lt.s32.totalorder %s1933_s7, %s1550_s9 }
 0x56c   : > { %608 = vadd.xlane.f32.xlu1 %v607_v58 }
 0x57d   : > { %954 = vrot.lane.b32.xlu1 %v1867_v11, %s1635_s29  ;;  %v1352_v11 = vpack.c.bf16 %v1038_v10, %v1037_v9  ;;  %s1551_s29 = scalar_lea.vmem %s1550_s9, 256 }
 0x57e   : > { %p1553_p9 = scmp.lt.s32.totalorder %s1551_s29, %s1545_s22 }
 0x57f   : > { %1353 = vmatpush3.bf16.msra.mxu0 %v1352_v11 }
 0x580   : > { %1354 = vmatprep.subr.bf16.mxu0 %v1622_v0  ;;  %p1554_p12 = por %p1553_p9, %p1552_p7 }
 0x582   : > { %p1555_p2 = pnand %p1554_p12, %p1548_p3 }
 0x583   : > { %1356 = vmatpush3.bf16.msra.mxu0 %v1355_v14 }
 0x5c4   : > { %v780_v59 = vpop.xlane.xlu1 %779 }
 0x5c8   : > { %v613_v60 = vpop.permute.xlu1 %612 }
 0x5c9   : > { %1310 = vmatpush3.msra.mxu1 %v613_v60 }
 0x5ca   : > { %1319 = vmatprep.subr.mxu1 %v1624_v1 }
 0x5d5   : > { %v951_v62 = vpop.xlane.xlu0 %950 }
 0x5d9   : > { %v784_v4 = vpop.permute.xlu0 %783 }
 0x5f9   : > { %v609_v61 = vpop.xlane.xlu1 %608 }
 0x5fa   : > { %1453 = vrcp.f32 %v609_v61 }
 0x5fb   : > { %1455 = vrcp.f32 %v780_v59 }
 0x5fc   : > { %1457 = vrcp.f32 %v951_v62 }
 0x5fd   : > { %v955_v7 = vpop.permute.xlu1 %954 }
 0x604   : > { %v1454_v63 = vpop.eup %1453 }
 0x605   : > { %v611_v2 = vmul.f32 %v1454_v63, %v1452_v57  ;;  %v1456_v3 = vpop.eup %1455 }
 0x606   : > { %v782_v5 = vmul.f32 %v1456_v3, %v1448_v48  ;;  %v1458_v6 = vpop.eup %1457 }
 0x607   : > { %1312 = vmatmul.mubr.msk.f32.vlgmr.msra.gmra.mrb[6].mxu1 %vm359_vm2, %v611_v2  ;;  %v953_v8 = vmul.f32 %v1458_v6, %v1450_v53 }
 0x608   : > { %1320 = vmatpush3.msra.mxu1 %v784_v4  ;;  %1321 = vmatprep.mubr.msk.f32.mxu1 %vm1623_vm0, %v1624_v1 }
 0x609   : > { %1329 = vmatprep.subr.mxu1 %v1624_v1 }
 0x60b   : > { %1322 = vmatmul.mubr.msk.f32.vlgmr.msra.gmra.mrb[8].mxu1 %vm359_vm2, %v782_v5 }
 0x60c   : > { %1330 = vmatpush3.msra.mxu1 %v955_v7  ;;  %1331 = vmatprep.mubr.msk.f32.mxu1 %vm1623_vm0, %v1624_v1 }
 0x60f   : > { %1332 = vmatmul.mubr.msk.f32.vlgmr.msra.gmra.mrb[10].mxu1 %vm359_vm2, %v953_v8 }
 0x6da   : > { %v684_v15 = vpop.f32.mrb[6].mxu1 }
 0x6db   : > { %689 = vrot.lane.b32.xlu1 %v684_v15, %s1636_s17  ;;  %v1313_v16 = vpop.f32.mrb[7].mxu1 }
 0x6de   : > { %v855_v17 = vpop.f32.mrb[8].mxu1 }
 0x6df   : > { %860 = vrot.lane.b32.xlu0 %v855_v17, %s1637_s24  ;;  %v1323_v1 = vpop.f32.mrb[9].mxu1 }
 0x6e2   : > { %v1026_v18 = vpop.f32.mrb[10].mxu1 }
 0x6e3   : > { %1031 = vrot.lane.b32.xlu1 %v1026_v18, %s1638_s26  ;;  %v1333_v19 = vpop.f32.mrb[11].mxu1 }
 0x74d   : > { %v690_v20 = vpop.permute.xlu1 %689 }
 0x74e   : > { %693 = vst.msk [vmem:[#allocation2] sm:$0xff] %vm692_vm3, %v690_v20 }
 0x751   : > { %v861_v0 = vpop.permute.xlu0 %860 }
 0x752   : > { %864 = vst.msk [vmem:[#allocation2] sm:$0xff] %vm863_vm4, %v861_v0 }
 0x755   : > { %v1032_v21 = vpop.permute.xlu1 %1031 }
 0x756   : > { %1035 = vst.msk [vmem:[#allocation2] sm:$0xff] %vm1034_vm5, %v1032_v21 }
 0x75d   : > { %v1036_v22 = vld [vmem:[#allocation2] sm:$0xff] }
 0x75e   : > { %1343 = vmatmul.mubr.msk.f32.vlgmr.msra.gmra.mrb[6].mxu0 %vm281_vm1, %v1036_v22 }
 0x831   : > { %v1117_v24 = vpop.f32.mrb[6].mxu0 }
 0x832   : > { %v1118_v25 = vadd.f32 %v1251_v23, %v1117_v24  ;;  %v1344_v26 = vpop.f32.mrb[7].mxu0 }
 0x834   : > { %1121 = vst.msk [vmem:[%s268_s28] sm:$0xff] %vm281_vm1, %v1118_v25 }
 0x835   : > { %1558 = shalt.err (!%p1555_p2)
}
 0x836   : > { %s1559_s12 = scalar_lea.hbm %s1931_s15, 128  ;;  %s1563_s26 = scalar_lea.hbm %s1981_s5, 256 }
 0x837   : > { %p1560_p13 = scmp.ne.s32.totalorder %s1931_s15, %s1559_s12  ;;  %p1564_p4 = scmp.lt.u32.totalorder %s1931_s15, %s1981_s5 }
 0x838   : > { %p1565_p5 = scmp.lt.u32.totalorder %s1563_s26, %s1559_s12  ;;  %p1567_p11 = scmp.lt.u32.totalorder %s1559_s12, %s1931_s15 }
 0x839   : > { %p1561_p6 = pnand %p1560_p13, %p1995_p0 }
 0x83a   : > { %p1566_p8 = por %p1565_p5, %p1564_p4 }
 0x83b   : > { %p1562_p10 = pneg %p1561_p6 }
 0x83c   : > { %p1568_p1 = por %p1567_p11, %p1566_p8 }
 0x83e   : > { %p1569_p3 = pnand %p1568_p1, %p1562_p10 }
 0x840   : > { %1572 = shalt.err (!%p1569_p3)
}
 0x841   : > { %1367 = dma.vmem_to_hbm [thread:$0]  (%p1995_p0), %s1933_s7, 128, %s1931_s15, %s1123_s16  }
 0x842 PF: > { %s1148_s11 = sand.u32 1, %s1603_s18   ;;  %p1996_p7 = scmp.ne.s32.totalorder %s1986_s25, 0 }
 0x843   : > { %p1997_p9 = scmp.ge.s32.totalorder %s1615_s21, 2  ;;  %s1149_s28 = scalar_lea.sflag [#allocation5], %s1148_s11 }
 0x845   : > { %p1381_p12 = pnand %p1997_p9, %p1996_p7 }
 0x847   : > { %1598 = dma.done.wait (!%p1381_p12), %s1149_s28, 128  }
 0x848   : > { %1600 = vsyncadd (!%p1381_p12), %s1149_s28, 4294967168  ;;  %p19_p2 = scmp.ge.s32.totalorder %s1780_s14, 4   ;;  %s1998_s18 = smov %s1607_s19 }
 0x849   : > { %s1999_s19 = smov %s1611_s20  ;;  %s2000_s20 = smov %s1796_s27 }
 0x84a   : > { %s2001_s21 = smov %s1780_s14  ;;  %21 = sbr.rel (!%p19_p2) target bundleno = 6 (0x6), region = 93 }
 0x851   :  { %1154 = vsyncpa [#allocation4], 1 }
 0x852   :  { %1156 = vsyncpa [#allocation4 + $0x1], 1 }
 0x853   :  { %1157 = vsyncpa [#allocation7], 1 }
 0x854   :  { %1158 = vsyncpa [#allocation5], 1 }
 0x855   :  { %1160 = vsyncpa [#allocation5 + $0x1], 1 }

</bundles_post_ra>
